<compile_context>
chip_gen: v6e
topology: v6e:2x2x1
jax: 0.10.0
libtpu: 0.0.40
codegen_flags: <defaults>
</compile_context>

<pallas_src>
import jax
import jax.numpy as jnp
from jax import lax
from jax.experimental import pallas as pl
from jax.experimental.pallas import tpu as pltpu

CHUNK = 8          # f32 sublanes per vreg
LANES = 128        # lanes per vreg
N_PARAMS = 27      # 3 axes + 9 R + 3 center + 12 P
MAX_BLK_SUB = 128  # max sublanes per grid step (16384 instances, ~1.7 MiB per input buffer)


def _round_up(x, m):
    return ((x + m - 1) // m) * m


def ellipsoid_bbox_kernel(prm_ref, out_ref):
    """prm_ref: (27, S_BLK, 128) f32, instance = sublane*128 + lane.
       out_ref: (4, S_BLK, 128) f32, rows = [xmin, ymin, xmax, ymax]."""
    n_chunks = prm_ref.shape[1] // CHUNK   # static (block shape)

    def chunk(c, carry):
        s0 = pl.multiple_of(c * CHUNK, CHUNK)
        sl = pl.ds(s0, CHUNK)

        def row(i):                         # full (8,128) vreg load of parameter i
            return prm_ref[i, sl, :]

        ax0, ax1, ax2 = row(0), row(1), row(2)
        R = [[row(3 + 3 * i + j) for j in range(3)] for i in range(3)]
        ctr = [row(12 + i) for i in range(3)]
        P = [[row(15 + 4 * i + j) for j in range(4)] for i in range(3)]

        # diag of the dual quadric in the ellipsoid frame (last entry -1 handled explicitly)
        d = [ax0 * ax0, ax1 * ax1, ax2 * ax2]

        # M = P @ transf  (3x4 per instance); transf = [[R, center], [0,0,0,1]]
        M = [[None] * 4 for _ in range(3)]
        for i in range(3):
            for k in range(3):
                M[i][k] = P[i][0] * R[0][k] + P[i][1] * R[1][k] + P[i][2] * R[2][k]
            M[i][3] = (P[i][0] * ctr[0] + P[i][1] * ctr[1] + P[i][2] * ctr[2]
                       + P[i][3])

        # Dual conic C = M @ diag(d, -1) @ M.T (symmetric). Precompute MD = M * d.
        MD = [[M[i][k] * d[k] for k in range(3)] for i in range(3)]

        def cij(i, j):
            return (MD[i][0] * M[j][0] + MD[i][1] * M[j][1]
                    + MD[i][2] * M[j][2] - M[i][3] * M[j][3])

        # The /(-Q[3,3]) quadric normalization is exactly 1; conic normalization below.
        inv = pl.reciprocal(-cij(2, 2), approx=True)   # EUP slot, not VALU
        c00 = cij(0, 0) * inv
        c01 = cij(0, 1) * inv
        c11 = cij(1, 1) * inv
        c02 = cij(0, 2) * inv
        c12 = cij(1, 2) * inv

        cx = -c02                         # ellipse center
        cy = -c12

        # Re-centered conic 2x2 block: C[:2,:2] + t t^T with t = C[:2,2]
        a = c00 + c02 * c02
        b = c01 + c02 * c12
        dd = c11 + c12 * c12

        # Closed-form symmetric 2x2 eigendecomposition (order/sign invariant for bbox).
        mean = 0.5 * (a + dd)
        diff = a - dd
        root = jnp.sqrt(diff * diff + 4.0 * b * b)
        lam_p = jnp.abs(mean + 0.5 * root)
        lam_m = jnp.abs(mean - 0.5 * root)
        pos = root > 0.0
        inv_root = pl.reciprocal(jnp.where(pos, root, 1.0), approx=True)
        cos2t = jnp.where(pos, diff * inv_root, 1.0)
        cos_sq = jnp.clip(0.5 * (1.0 + cos2t), 0.0, 1.0)   # guard |cos2t|>1 ulps
        sin_sq = 1.0 - cos_sq

        xmax = jnp.sqrt(jnp.maximum(lam_p * cos_sq + lam_m * sin_sq, 0.0))
        ymax = jnp.sqrt(jnp.maximum(lam_p * sin_sq + lam_m * cos_sq, 0.0))

        # four lane-dense full-vreg row stores (no concatenate, no padding rows)
        out_ref[0, sl, :] = cx - xmax
        out_ref[1, sl, :] = cy - ymax
        out_ref[2, sl, :] = cx + xmax
        out_ref[3, sl, :] = cy + ymax
        return carry

    lax.fori_loop(0, n_chunks, chunk, 0)


def _pack_params(axes, R, center, P, s_pad):
    """Pack per-instance parameters into (27, s_pad, 128): instance = sublane*128 + lane."""
    B = axes.shape[0]
    flat = jnp.concatenate(
        [axes.reshape(B, 3),
         R.reshape(B, 9),
         center.reshape(B, 3),
         P.reshape(B, 12)],
        axis=1).astype(jnp.float32)                      # (B, 27)
    total = s_pad * LANES
    flat = jnp.pad(flat, ((0, total - B), (0, 0)))       # cheap zero pad (padded lanes discarded)
    return flat.reshape(s_pad, LANES, N_PARAMS).transpose(2, 0, 1)   # (27, s_pad, 128)


def ellipsoid_forward_batched(axes, R, center, P):
    """Batched Pallas equivalent of Ellipsoid_tensor(...).forward(P).

    axes: (B,3), R: (B,3,3), center: (B,3), P: (3,4) or (B,3,4).  Returns (B,4) bboxes.
    """
    axes = jnp.asarray(axes, jnp.float32)
    R = jnp.asarray(R, jnp.float32)
    center = jnp.asarray(center, jnp.float32)
    P = jnp.asarray(P, jnp.float32)
    B = axes.shape[0]
    if P.ndim == 2:
        P = jnp.broadcast_to(P, (B, 3, 4))

    # sublane count (instances per sublane-row of 128 lanes), rounded to vreg chunks
    s_sub = _round_up(max(-(-B // LANES), 1), CHUNK)
    if s_sub <= CHUNK:
        s_blk = s_sub                                     # one 8-sublane block
    else:
        # keep >= 2 grid steps (v7x megacore), cap block at MAX_BLK_SUB sublanes
        s_blk = min(MAX_BLK_SUB, _round_up(-(-s_sub // 2), CHUNK))
    s_pad = _round_up(s_sub, s_blk)
    n_tiles = s_pad // s_blk

    # TODO(synk): for very large B, produce params in this layout upstream to avoid
    # the extra XLA packing pass (kernel itself is HBM-bound at ~144 B/instance).
    params = _pack_params(axes, R, center, P, s_pad)      # (27, s_pad, 128)

    out = pl.pallas_call(
        ellipsoid_bbox_kernel,
        out_shape=jax.ShapeDtypeStruct((4, s_pad, LANES), jnp.float32),
        grid=(n_tiles,),
        in_specs=[pl.BlockSpec((N_PARAMS, s_blk, LANES), lambda i: (0, i, 0))],
        out_specs=pl.BlockSpec((4, s_blk, LANES), lambda i: (0, i, 0)),
        compiler_params=pltpu.CompilerParams(
            dimension_semantics=("parallel",)),
    )(params)

    return out.transpose(1, 2, 0).reshape(s_pad * LANES, 4)[:B]      # (B, 4)


def ellipsoid_forward(axes, R, center, P):
    """Single-instance wrapper matching the module's forward(P) signature."""
    return ellipsoid_forward_batched(axes[None], R[None], center[None], P)[0]


def reference_forward(axes, R, center, P):
    """Pure-JAX mirror of the PyTorch forward (uses eigh; order/sign-invariant)."""
    axes = axes.astype(jnp.float32)
    Q_star = jnp.diag(jnp.concatenate([axes[:3] ** 2, jnp.array([-1.0], jnp.float32)]))
    T_center = jnp.eye(4, dtype=jnp.float32).at[:3, 3].set(center)
    Rw_e = jnp.eye(4, dtype=jnp.float32).at[:3, :3].set(R)
    transf = T_center @ Rw_e
    Q_star = transf @ Q_star @ transf.T
    Q_ = 0.5 * (Q_star + Q_star.T)
    Q_ = Q_ / (-Q_[3, 3])
    C = P @ Q_ @ P.T
    C_sys = 0.5 * (C + C.T)
    C_sys = C_sys / (-C_sys[2, 2])
    center2 = -C_sys[:2, 2]
    T_c = jnp.eye(3, dtype=jnp.float32).at[:2, 2].set(-center2)
    temp = T_c @ C_sys @ T_c.T
    C_center = 0.5 * (temp + temp.T)
    eig_vals, eig_vecs = jnp.linalg.eigh(C_center[:2, :2])
    ax = jnp.sqrt(jnp.abs(eig_vals))
    angle = jnp.arctan2(eig_vecs[1, 0], eig_vecs[0, 0])
    cth, sth = jnp.cos(angle), jnp.sin(angle)
    xmax = jnp.sqrt(ax[0] ** 2 * cth ** 2 + ax[1] ** 2 * sth ** 2)
    ymax = jnp.sqrt(ax[0] ** 2 * sth ** 2 + ax[1] ** 2 * cth ** 2)
    return jnp.stack([center2[0] - xmax, center2[1] - ymax,
                      center2[0] + xmax, center2[1] + ymax])


if __name__ == "__main__":
    key = jax.random.PRNGKey(0)

    def make_inputs(B, k):
        k1, k2, k3 = jax.random.split(k, 3)
        axes = 0.8 + 0.8 * jax.random.uniform(k1, (B, 3), dtype=jnp.float32)     # semi-axes
        yaw = jax.random.uniform(k2, (B,), dtype=jnp.float32) - 0.5              # rotation about z
        cyw, syw = jnp.cos(yaw), jnp.sin(yaw)
        R = (jnp.broadcast_to(jnp.eye(3, dtype=jnp.float32), (B, 3, 3))
             .at[:, 0, 0].set(cyw).at[:, 0, 1].set(-syw)
             .at[:, 1, 0].set(syw).at[:, 1, 1].set(cyw))
        center = (jnp.array([0.3, -0.4, 8.0], jnp.float32)[None, :]
                  + 0.2 * jax.random.normal(k3, (B, 3), dtype=jnp.float32))
        return axes, R, center

    # forward input: 3x4 camera projection matrix P = K @ [I | 0] (shared by the batch)
    P = jnp.array([[80.0, 0.0, 0.0, 0.0],
                   [0.0, 80.0, 0.0, 0.0],
                   [0.0, 0.0, 1.0, 0.0]], jnp.float32)

    ref_batched = jax.vmap(reference_forward, in_axes=(0, 0, 0, None))
    kA, kB = jax.random.split(key)

    # --- small batch (single grid step, single sublane chunk) ---
    B = 8
    axes, R, center = make_inputs(B, kA)
    bbox = jax.block_until_ready(ellipsoid_forward_batched(axes, R, center, P))
    ref = ref_batched(axes, R, center, P)
    assert bbox.shape == (B, 4)
    assert bool(jnp.all(jnp.isfinite(bbox)))
    assert bool(jnp.allclose(bbox, ref, rtol=2e-2, atol=2e-1)), (bbox, ref)

    # --- larger batch exercising the multi-step parallel grid path ---
    B2 = 1500
    axes2, R2, center2 = make_inputs(B2, kB)
    bbox2 = jax.block_until_ready(ellipsoid_forward_batched(axes2, R2, center2, P))
    ref2 = ref_batched(axes2, R2, center2, P)
    assert bbox2.shape == (B2, 4)
    assert bool(jnp.all(jnp.isfinite(bbox2)))
    assert bool(jnp.allclose(bbox2, ref2, rtol=2e-2, atol=2e-1)), "large-batch mismatch"

    # --- single-instance path (exact signature of the original module's forward) ---
    b0 = jax.block_until_ready(ellipsoid_forward(axes[0], R[0], center[0], P))
    assert b0.shape == (4,)
    assert bool(jnp.allclose(b0, ref[0], rtol=2e-2, atol=2e-1)), (b0, ref[0])

    print("KERNEL_OK")
</pallas_src>

<mosaic_0001>
module attributes {stable_mosaic.version = 11 : i64} {
  func.func @ellipsoid_bbox_kernel(%arg0: i32, %arg1: memref<27x8x128xf32, #tpu.memory_space<vmem>>, %arg2: memref<4x8x128xf32, #tpu.memory_space<vmem>>) attributes {dimension_semantics = [#tpu.dimension_semantics<parallel>], iteration_bounds = array<i64: 1>, scalar_prefetch = 0 : i64, scratch_operands = 0 : i64, tpu.core_type = #tpu.core_type<tc>, window_params = [{transform_indices = @transform_0, window_bounds = array<i64: 27, 8, 128>}, {transform_indices = @transform_1, window_bounds = array<i64: 4, 8, 128>}]} {
    %c0_i32 = arith.constant 0 : i32
    %c8_i32 = arith.constant 8 : i32
    %0 = arith.muli %c0_i32, %c8_i32 : i32
    %1 = tpu.assume_multiple %0, 8 : i32
    %c0 = arith.constant 0 : index
    %2 = arith.index_cast %1 : i32 to index
    %c0_0 = arith.constant 0 : index
    %3 = vector.load %arg1[%c0, %2, %c0_0] : memref<27x8x128xf32, #tpu.memory_space<vmem>>, vector<1x8x128xf32>
    %4 = vector.shape_cast %3 : vector<1x8x128xf32> to vector<8x128xf32>
    %c1 = arith.constant 1 : index
    %5 = arith.index_cast %1 : i32 to index
    %c0_1 = arith.constant 0 : index
    %6 = vector.load %arg1[%c1, %5, %c0_1] : memref<27x8x128xf32, #tpu.memory_space<vmem>>, vector<1x8x128xf32>
    %7 = vector.shape_cast %6 : vector<1x8x128xf32> to vector<8x128xf32>
    %c2 = arith.constant 2 : index
    %8 = arith.index_cast %1 : i32 to index
    %c0_2 = arith.constant 0 : index
    %9 = vector.load %arg1[%c2, %8, %c0_2] : memref<27x8x128xf32, #tpu.memory_space<vmem>>, vector<1x8x128xf32>
    %10 = vector.shape_cast %9 : vector<1x8x128xf32> to vector<8x128xf32>
    %c3 = arith.constant 3 : index
    %11 = arith.index_cast %1 : i32 to index
    %c0_3 = arith.constant 0 : index
    %12 = vector.load %arg1[%c3, %11, %c0_3] : memref<27x8x128xf32, #tpu.memory_space<vmem>>, vector<1x8x128xf32>
    %13 = vector.shape_cast %12 : vector<1x8x128xf32> to vector<8x128xf32>
    %c4 = arith.constant 4 : index
    %14 = arith.index_cast %1 : i32 to index
    %c0_4 = arith.constant 0 : index
    %15 = vector.load %arg1[%c4, %14, %c0_4] : memref<27x8x128xf32, #tpu.memory_space<vmem>>, vector<1x8x128xf32>
    %16 = vector.shape_cast %15 : vector<1x8x128xf32> to vector<8x128xf32>
    %c5 = arith.constant 5 : index
    %17 = arith.index_cast %1 : i32 to index
    %c0_5 = arith.constant 0 : index
    %18 = vector.load %arg1[%c5, %17, %c0_5] : memref<27x8x128xf32, #tpu.memory_space<vmem>>, vector<1x8x128xf32>
    %19 = vector.shape_cast %18 : vector<1x8x128xf32> to vector<8x128xf32>
    %c6 = arith.constant 6 : index
    %20 = arith.index_cast %1 : i32 to index
    %c0_6 = arith.constant 0 : index
    %21 = vector.load %arg1[%c6, %20, %c0_6] : memref<27x8x128xf32, #tpu.memory_space<vmem>>, vector<1x8x128xf32>
    %22 = vector.shape_cast %21 : vector<1x8x128xf32> to vector<8x128xf32>
    %c7 = arith.constant 7 : index
    %23 = arith.index_cast %1 : i32 to index
    %c0_7 = arith.constant 0 : index
    %24 = vector.load %arg1[%c7, %23, %c0_7] : memref<27x8x128xf32, #tpu.memory_space<vmem>>, vector<1x8x128xf32>
    %25 = vector.shape_cast %24 : vector<1x8x128xf32> to vector<8x128xf32>
    %c8 = arith.constant 8 : index
    %26 = arith.index_cast %1 : i32 to index
    %c0_8 = arith.constant 0 : index
    %27 = vector.load %arg1[%c8, %26, %c0_8] : memref<27x8x128xf32, #tpu.memory_space<vmem>>, vector<1x8x128xf32>
    %28 = vector.shape_cast %27 : vector<1x8x128xf32> to vector<8x128xf32>
    %c9 = arith.constant 9 : index
    %29 = arith.index_cast %1 : i32 to index
    %c0_9 = arith.constant 0 : index
    %30 = vector.load %arg1[%c9, %29, %c0_9] : memref<27x8x128xf32, #tpu.memory_space<vmem>>, vector<1x8x128xf32>
    %31 = vector.shape_cast %30 : vector<1x8x128xf32> to vector<8x128xf32>
    %c10 = arith.constant 10 : index
    %32 = arith.index_cast %1 : i32 to index
    %c0_10 = arith.constant 0 : index
    %33 = vector.load %arg1[%c10, %32, %c0_10] : memref<27x8x128xf32, #tpu.memory_space<vmem>>, vector<1x8x128xf32>
    %34 = vector.shape_cast %33 : vector<1x8x128xf32> to vector<8x128xf32>
    %c11 = arith.constant 11 : index
    %35 = arith.index_cast %1 : i32 to index
    %c0_11 = arith.constant 0 : index
    %36 = vector.load %arg1[%c11, %35, %c0_11] : memref<27x8x128xf32, #tpu.memory_space<vmem>>, vector<1x8x128xf32>
    %37 = vector.shape_cast %36 : vector<1x8x128xf32> to vector<8x128xf32>
    %c12 = arith.constant 12 : index
    %38 = arith.index_cast %1 : i32 to index
    %c0_12 = arith.constant 0 : index
    %39 = vector.load %arg1[%c12, %38, %c0_12] : memref<27x8x128xf32, #tpu.memory_space<vmem>>, vector<1x8x128xf32>
    %40 = vector.shape_cast %39 : vector<1x8x128xf32> to vector<8x128xf32>
    %c13 = arith.constant 13 : index
    %41 = arith.index_cast %1 : i32 to index
    %c0_13 = arith.constant 0 : index
    %42 = vector.load %arg1[%c13, %41, %c0_13] : memref<27x8x128xf32, #tpu.memory_space<vmem>>, vector<1x8x128xf32>
    %43 = vector.shape_cast %42 : vector<1x8x128xf32> to vector<8x128xf32>
    %c14 = arith.constant 14 : index
    %44 = arith.index_cast %1 : i32 to index
    %c0_14 = arith.constant 0 : index
    %45 = vector.load %arg1[%c14, %44, %c0_14] : memref<27x8x128xf32, #tpu.memory_space<vmem>>, vector<1x8x128xf32>
    %46 = vector.shape_cast %45 : vector<1x8x128xf32> to vector<8x128xf32>
    %c15 = arith.constant 15 : index
    %47 = arith.index_cast %1 : i32 to index
    %c0_15 = arith.constant 0 : index
    %48 = vector.load %arg1[%c15, %47, %c0_15] : memref<27x8x128xf32, #tpu.memory_space<vmem>>, vector<1x8x128xf32>
    %49 = vector.shape_cast %48 : vector<1x8x128xf32> to vector<8x128xf32>
    %c16 = arith.constant 16 : index
    %50 = arith.index_cast %1 : i32 to index
    %c0_16 = arith.constant 0 : index
    %51 = vector.load %arg1[%c16, %50, %c0_16] : memref<27x8x128xf32, #tpu.memory_space<vmem>>, vector<1x8x128xf32>
    %52 = vector.shape_cast %51 : vector<1x8x128xf32> to vector<8x128xf32>
    %c17 = arith.constant 17 : index
    %53 = arith.index_cast %1 : i32 to index
    %c0_17 = arith.constant 0 : index
    %54 = vector.load %arg1[%c17, %53, %c0_17] : memref<27x8x128xf32, #tpu.memory_space<vmem>>, vector<1x8x128xf32>
    %55 = vector.shape_cast %54 : vector<1x8x128xf32> to vector<8x128xf32>
    %c18 = arith.constant 18 : index
    %56 = arith.index_cast %1 : i32 to index
    %c0_18 = arith.constant 0 : index
    %57 = vector.load %arg1[%c18, %56, %c0_18] : memref<27x8x128xf32, #tpu.memory_space<vmem>>, vector<1x8x128xf32>
    %58 = vector.shape_cast %57 : vector<1x8x128xf32> to vector<8x128xf32>
    %c19 = arith.constant 19 : index
    %59 = arith.index_cast %1 : i32 to index
    %c0_19 = arith.constant 0 : index
    %60 = vector.load %arg1[%c19, %59, %c0_19] : memref<27x8x128xf32, #tpu.memory_space<vmem>>, vector<1x8x128xf32>
    %61 = vector.shape_cast %60 : vector<1x8x128xf32> to vector<8x128xf32>
    %c20 = arith.constant 20 : index
    %62 = arith.index_cast %1 : i32 to index
    %c0_20 = arith.constant 0 : index
    %63 = vector.load %arg1[%c20, %62, %c0_20] : memref<27x8x128xf32, #tpu.memory_space<vmem>>, vector<1x8x128xf32>
    %64 = vector.shape_cast %63 : vector<1x8x128xf32> to vector<8x128xf32>
    %c21 = arith.constant 21 : index
    %65 = arith.index_cast %1 : i32 to index
    %c0_21 = arith.constant 0 : index
    %66 = vector.load %arg1[%c21, %65, %c0_21] : memref<27x8x128xf32, #tpu.memory_space<vmem>>, vector<1x8x128xf32>
    %67 = vector.shape_cast %66 : vector<1x8x128xf32> to vector<8x128xf32>
    %c22 = arith.constant 22 : index
    %68 = arith.index_cast %1 : i32 to index
    %c0_22 = arith.constant 0 : index
    %69 = vector.load %arg1[%c22, %68, %c0_22] : memref<27x8x128xf32, #tpu.memory_space<vmem>>, vector<1x8x128xf32>
    %70 = vector.shape_cast %69 : vector<1x8x128xf32> to vector<8x128xf32>
    %c23 = arith.constant 23 : index
    %71 = arith.index_cast %1 : i32 to index
    %c0_23 = arith.constant 0 : index
    %72 = vector.load %arg1[%c23, %71, %c0_23] : memref<27x8x128xf32, #tpu.memory_space<vmem>>, vector<1x8x128xf32>
    %73 = vector.shape_cast %72 : vector<1x8x128xf32> to vector<8x128xf32>
    %c24 = arith.constant 24 : index
    %74 = arith.index_cast %1 : i32 to index
    %c0_24 = arith.constant 0 : index
    %75 = vector.load %arg1[%c24, %74, %c0_24] : memref<27x8x128xf32, #tpu.memory_space<vmem>>, vector<1x8x128xf32>
    %76 = vector.shape_cast %75 : vector<1x8x128xf32> to vector<8x128xf32>
    %c25 = arith.constant 25 : index
    %77 = arith.index_cast %1 : i32 to index
    %c0_25 = arith.constant 0 : index
    %78 = vector.load %arg1[%c25, %77, %c0_25] : memref<27x8x128xf32, #tpu.memory_space<vmem>>, vector<1x8x128xf32>
    %79 = vector.shape_cast %78 : vector<1x8x128xf32> to vector<8x128xf32>
    %c26 = arith.constant 26 : index
    %80 = arith.index_cast %1 : i32 to index
    %c0_26 = arith.constant 0 : index
    %81 = vector.load %arg1[%c26, %80, %c0_26] : memref<27x8x128xf32, #tpu.memory_space<vmem>>, vector<1x8x128xf32>
    %82 = vector.shape_cast %81 : vector<1x8x128xf32> to vector<8x128xf32>
    %83 = arith.mulf %4, %4 : vector<8x128xf32>
    %84 = arith.mulf %7, %7 : vector<8x128xf32>
    %85 = arith.mulf %10, %10 : vector<8x128xf32>
    %86 = arith.mulf %49, %13 : vector<8x128xf32>
    %87 = arith.mulf %52, %22 : vector<8x128xf32>
    %88 = arith.addf %86, %87 : vector<8x128xf32>
    %89 = arith.mulf %55, %31 : vector<8x128xf32>
    %90 = arith.addf %88, %89 : vector<8x128xf32>
    %91 = arith.mulf %49, %16 : vector<8x128xf32>
    %92 = arith.mulf %52, %25 : vector<8x128xf32>
    %93 = arith.addf %91, %92 : vector<8x128xf32>
    %94 = arith.mulf %55, %34 : vector<8x128xf32>
    %95 = arith.addf %93, %94 : vector<8x128xf32>
    %96 = arith.mulf %49, %19 : vector<8x128xf32>
    %97 = arith.mulf %52, %28 : vector<8x128xf32>
    %98 = arith.addf %96, %97 : vector<8x128xf32>
    %99 = arith.mulf %55, %37 : vector<8x128xf32>
    %100 = arith.addf %98, %99 : vector<8x128xf32>
    %101 = arith.mulf %49, %40 : vector<8x128xf32>
    %102 = arith.mulf %52, %43 : vector<8x128xf32>
    %103 = arith.addf %101, %102 : vector<8x128xf32>
    %104 = arith.mulf %55, %46 : vector<8x128xf32>
    %105 = arith.addf %103, %104 : vector<8x128xf32>
    %106 = arith.addf %105, %58 : vector<8x128xf32>
    %107 = arith.mulf %61, %13 : vector<8x128xf32>
    %108 = arith.mulf %64, %22 : vector<8x128xf32>
    %109 = arith.addf %107, %108 : vector<8x128xf32>
    %110 = arith.mulf %67, %31 : vector<8x128xf32>
    %111 = arith.addf %109, %110 : vector<8x128xf32>
    %112 = arith.mulf %61, %16 : vector<8x128xf32>
    %113 = arith.mulf %64, %25 : vector<8x128xf32>
    %114 = arith.addf %112, %113 : vector<8x128xf32>
    %115 = arith.mulf %67, %34 : vector<8x128xf32>
    %116 = arith.addf %114, %115 : vector<8x128xf32>
    %117 = arith.mulf %61, %19 : vector<8x128xf32>
    %118 = arith.mulf %64, %28 : vector<8x128xf32>
    %119 = arith.addf %117, %118 : vector<8x128xf32>
    %120 = arith.mulf %67, %37 : vector<8x128xf32>
    %121 = arith.addf %119, %120 : vector<8x128xf32>
    %122 = arith.mulf %61, %40 : vector<8x128xf32>
    %123 = arith.mulf %64, %43 : vector<8x128xf32>
    %124 = arith.addf %122, %123 : vector<8x128xf32>
    %125 = arith.mulf %67, %46 : vector<8x128xf32>
    %126 = arith.addf %124, %125 : vector<8x128xf32>
    %127 = arith.addf %126, %70 : vector<8x128xf32>
    %128 = arith.mulf %73, %13 : vector<8x128xf32>
    %129 = arith.mulf %76, %22 : vector<8x128xf32>
    %130 = arith.addf %128, %129 : vector<8x128xf32>
    %131 = arith.mulf %79, %31 : vector<8x128xf32>
    %132 = arith.addf %130, %131 : vector<8x128xf32>
    %133 = arith.mulf %73, %16 : vector<8x128xf32>
    %134 = arith.mulf %76, %25 : vector<8x128xf32>
    %135 = arith.addf %133, %134 : vector<8x128xf32>
    %136 = arith.mulf %79, %34 : vector<8x128xf32>
    %137 = arith.addf %135, %136 : vector<8x128xf32>
    %138 = arith.mulf %73, %19 : vector<8x128xf32>
    %139 = arith.mulf %76, %28 : vector<8x128xf32>
    %140 = arith.addf %138, %139 : vector<8x128xf32>
    %141 = arith.mulf %79, %37 : vector<8x128xf32>
    %142 = arith.addf %140, %141 : vector<8x128xf32>
    %143 = arith.mulf %73, %40 : vector<8x128xf32>
    %144 = arith.mulf %76, %43 : vector<8x128xf32>
    %145 = arith.addf %143, %144 : vector<8x128xf32>
    %146 = arith.mulf %79, %46 : vector<8x128xf32>
    %147 = arith.addf %145, %146 : vector<8x128xf32>
    %148 = arith.addf %147, %82 : vector<8x128xf32>
    %149 = arith.mulf %90, %83 : vector<8x128xf32>
    %150 = arith.mulf %95, %84 : vector<8x128xf32>
    %151 = arith.mulf %100, %85 : vector<8x128xf32>
    %152 = arith.mulf %111, %83 : vector<8x128xf32>
    %153 = arith.mulf %116, %84 : vector<8x128xf32>
    %154 = arith.mulf %121, %85 : vector<8x128xf32>
    %155 = arith.mulf %132, %83 : vector<8x128xf32>
    %156 = arith.mulf %137, %84 : vector<8x128xf32>
    %157 = arith.mulf %142, %85 : vector<8x128xf32>
    %158 = arith.mulf %155, %132 : vector<8x128xf32>
    %159 = arith.mulf %156, %137 : vector<8x128xf32>
    %160 = arith.addf %158, %159 : vector<8x128xf32>
    %161 = arith.mulf %157, %142 : vector<8x128xf32>
    %162 = arith.addf %160, %161 : vector<8x128xf32>
    %163 = arith.mulf %148, %148 : vector<8x128xf32>
    %164 = arith.subf %162, %163 : vector<8x128xf32>
    %cst = arith.constant 0.000000e+00 : f32
    %165 = vector.broadcast %cst : f32 to vector<8x128xf32>
    %166 = arith.subf %165, %164 : vector<8x128xf32>
    %167 = tpu.reciprocal %166 {approx = true} : vector<8x128xf32> -> vector<8x128xf32>
    %168 = arith.mulf %149, %90 : vector<8x128xf32>
    %169 = arith.mulf %150, %95 : vector<8x128xf32>
    %170 = arith.addf %168, %169 : vector<8x128xf32>
    %171 = arith.mulf %151, %100 : vector<8x128xf32>
    %172 = arith.addf %170, %171 : vector<8x128xf32>
    %173 = arith.mulf %106, %106 : vector<8x128xf32>
    %174 = arith.subf %172, %173 : vector<8x128xf32>
    %175 = arith.mulf %174, %167 : vector<8x128xf32>
    %176 = arith.mulf %149, %111 : vector<8x128xf32>
    %177 = arith.mulf %150, %116 : vector<8x128xf32>
    %178 = arith.addf %176, %177 : vector<8x128xf32>
    %179 = arith.mulf %151, %121 : vector<8x128xf32>
    %180 = arith.addf %178, %179 : vector<8x128xf32>
    %181 = arith.mulf %106, %127 : vector<8x128xf32>
    %182 = arith.subf %180, %181 : vector<8x128xf32>
    %183 = arith.mulf %182, %167 : vector<8x128xf32>
    %184 = arith.mulf %152, %111 : vector<8x128xf32>
    %185 = arith.mulf %153, %116 : vector<8x128xf32>
    %186 = arith.addf %184, %185 : vector<8x128xf32>
    %187 = arith.mulf %154, %121 : vector<8x128xf32>
    %188 = arith.addf %186, %187 : vector<8x128xf32>
    %189 = arith.mulf %127, %127 : vector<8x128xf32>
    %190 = arith.subf %188, %189 : vector<8x128xf32>
    %191 = arith.mulf %190, %167 : vector<8x128xf32>
    %192 = arith.mulf %149, %132 : vector<8x128xf32>
    %193 = arith.mulf %150, %137 : vector<8x128xf32>
    %194 = arith.addf %192, %193 : vector<8x128xf32>
    %195 = arith.mulf %151, %142 : vector<8x128xf32>
    %196 = arith.addf %194, %195 : vector<8x128xf32>
    %197 = arith.mulf %106, %148 : vector<8x128xf32>
    %198 = arith.subf %196, %197 : vector<8x128xf32>
    %199 = arith.mulf %198, %167 : vector<8x128xf32>
    %200 = arith.mulf %152, %132 : vector<8x128xf32>
    %201 = arith.mulf %153, %137 : vector<8x128xf32>
    %202 = arith.addf %200, %201 : vector<8x128xf32>
    %203 = arith.mulf %154, %142 : vector<8x128xf32>
    %204 = arith.addf %202, %203 : vector<8x128xf32>
    %205 = arith.mulf %127, %148 : vector<8x128xf32>
    %206 = arith.subf %204, %205 : vector<8x128xf32>
    %207 = arith.mulf %206, %167 : vector<8x128xf32>
    %cst_27 = arith.constant 0.000000e+00 : f32
    %208 = vector.broadcast %cst_27 : f32 to vector<8x128xf32>
    %209 = arith.subf %208, %199 : vector<8x128xf32>
    %cst_28 = arith.constant 0.000000e+00 : f32
    %210 = vector.broadcast %cst_28 : f32 to vector<8x128xf32>
    %211 = arith.subf %210, %207 : vector<8x128xf32>
    %212 = arith.mulf %199, %199 : vector<8x128xf32>
    %213 = arith.addf %175, %212 : vector<8x128xf32>
    %214 = arith.mulf %199, %207 : vector<8x128xf32>
    %215 = arith.addf %183, %214 : vector<8x128xf32>
    %216 = arith.mulf %207, %207 : vector<8x128xf32>
    %217 = arith.addf %191, %216 : vector<8x128xf32>
    %218 = arith.addf %213, %217 : vector<8x128xf32>
    %cst_29 = arith.constant 5.000000e-01 : f32
    %219 = vector.broadcast %cst_29 : f32 to vector<8x128xf32>
    %220 = arith.mulf %219, %218 : vector<8x128xf32>
    %221 = arith.subf %213, %217 : vector<8x128xf32>
    %222 = arith.mulf %221, %221 : vector<8x128xf32>
    %cst_30 = arith.constant 4.000000e+00 : f32
    %223 = vector.broadcast %cst_30 : f32 to vector<8x128xf32>
    %224 = arith.mulf %223, %215 : vector<8x128xf32>
    %225 = arith.mulf %224, %215 : vector<8x128xf32>
    %226 = arith.addf %222, %225 : vector<8x128xf32>
    %227 = math.sqrt %226 : vector<8x128xf32>
    %cst_31 = arith.constant 5.000000e-01 : f32
    %228 = vector.broadcast %cst_31 : f32 to vector<8x128xf32>
    %229 = arith.mulf %228, %227 : vector<8x128xf32>
    %230 = arith.addf %220, %229 : vector<8x128xf32>
    %231 = math.absf %230 : vector<8x128xf32>
    %cst_32 = arith.constant 5.000000e-01 : f32
    %232 = vector.broadcast %cst_32 : f32 to vector<8x128xf32>
    %233 = arith.mulf %232, %227 : vector<8x128xf32>
    %234 = arith.subf %220, %233 : vector<8x128xf32>
    %235 = math.absf %234 : vector<8x128xf32>
    %cst_33 = arith.constant 0.000000e+00 : f32
    %236 = vector.broadcast %cst_33 : f32 to vector<8x128xf32>
    %237 = arith.cmpf ogt, %227, %236 : vector<8x128xf32>
    %cst_34 = arith.constant 1.000000e+00 : f32
    %238 = vector.broadcast %cst_34 : f32 to vector<8x128xf32>
    %239 = arith.select %237, %227, %238 : vector<8x128xi1>, vector<8x128xf32>
    %240 = tpu.reciprocal %239 {approx = true} : vector<8x128xf32> -> vector<8x128xf32>
    %241 = arith.mulf %221, %240 : vector<8x128xf32>
    %cst_35 = arith.constant 1.000000e+00 : f32
    %242 = vector.broadcast %cst_35 : f32 to vector<8x128xf32>
    %243 = arith.select %237, %241, %242 : vector<8x128xi1>, vector<8x128xf32>
    %cst_36 = arith.constant 1.000000e+00 : f32
    %244 = vector.broadcast %cst_36 : f32 to vector<8x128xf32>
    %245 = arith.addf %244, %243 : vector<8x128xf32>
    %cst_37 = arith.constant 5.000000e-01 : f32
    %246 = vector.broadcast %cst_37 : f32 to vector<8x128xf32>
    %247 = arith.mulf %246, %245 : vector<8x128xf32>
    %cst_38 = arith.constant 0.000000e+00 : f32
    %cst_39 = arith.constant 1.000000e+00 : f32
    %248 = vector.broadcast %cst_38 : f32 to vector<8x128xf32>
    %249 = arith.maximumf %248, %247 : vector<8x128xf32>
    %250 = vector.broadcast %cst_39 : f32 to vector<8x128xf32>
    %251 = arith.minimumf %250, %249 : vector<8x128xf32>
    %cst_40 = arith.constant 1.000000e+00 : f32
    %252 = vector.broadcast %cst_40 : f32 to vector<8x128xf32>
    %253 = arith.subf %252, %251 : vector<8x128xf32>
    %254 = arith.mulf %231, %251 : vector<8x128xf32>
    %255 = arith.mulf %235, %253 : vector<8x128xf32>
    %256 = arith.addf %254, %255 : vector<8x128xf32>
    %cst_41 = arith.constant 0.000000e+00 : f32
    %257 = vector.broadcast %cst_41 : f32 to vector<8x128xf32>
    %258 = arith.maximumf %256, %257 : vector<8x128xf32>
    %259 = math.sqrt %258 : vector<8x128xf32>
    %260 = arith.mulf %231, %253 : vector<8x128xf32>
    %261 = arith.mulf %235, %251 : vector<8x128xf32>
    %262 = arith.addf %260, %261 : vector<8x128xf32>
    %cst_42 = arith.constant 0.000000e+00 : f32
    %263 = vector.broadcast %cst_42 : f32 to vector<8x128xf32>
    %264 = arith.maximumf %262, %263 : vector<8x128xf32>
    %265 = math.sqrt %264 : vector<8x128xf32>
    %266 = arith.subf %209, %259 : vector<8x128xf32>
    %c0_43 = arith.constant 0 : index
    %267 = arith.index_cast %1 : i32 to index
    %c0_44 = arith.constant 0 : index
    %268 = vector.load %arg2[%c0_43, %267, %c0_44] : memref<4x8x128xf32, #tpu.memory_space<vmem>>, vector<1x8x128xf32>
    %269 = vector.shape_cast %268 : vector<1x8x128xf32> to vector<8x128xf32>
    %270 = vector.shape_cast %266 : vector<8x128xf32> to vector<1x8x128xf32>
    tpu.vector_store %arg2[%c0_43, %267, %c0_44], %270 {strides = array<i32>} : memref<4x8x128xf32, #tpu.memory_space<vmem>>, vector<1x8x128xf32>,
    %271 = arith.subf %211, %265 : vector<8x128xf32>
    %c1_45 = arith.constant 1 : index
    %272 = arith.index_cast %1 : i32 to index
    %c0_46 = arith.constant 0 : index
    %273 = vector.load %arg2[%c1_45, %272, %c0_46] : memref<4x8x128xf32, #tpu.memory_space<vmem>>, vector<1x8x128xf32>
    %274 = vector.shape_cast %273 : vector<1x8x128xf32> to vector<8x128xf32>
    %275 = vector.shape_cast %271 : vector<8x128xf32> to vector<1x8x128xf32>
    tpu.vector_store %arg2[%c1_45, %272, %c0_46], %275 {strides = array<i32>} : memref<4x8x128xf32, #tpu.memory_space<vmem>>, vector<1x8x128xf32>,
    %276 = arith.addf %209, %259 : vector<8x128xf32>
    %c2_47 = arith.constant 2 : index
    %277 = arith.index_cast %1 : i32 to index
    %c0_48 = arith.constant 0 : index
    %278 = vector.load %arg2[%c2_47, %277, %c0_48] : memref<4x8x128xf32, #tpu.memory_space<vmem>>, vector<1x8x128xf32>
    %279 = vector.shape_cast %278 : vector<1x8x128xf32> to vector<8x128xf32>
    %280 = vector.shape_cast %276 : vector<8x128xf32> to vector<1x8x128xf32>
    tpu.vector_store %arg2[%c2_47, %277, %c0_48], %280 {strides = array<i32>} : memref<4x8x128xf32, #tpu.memory_space<vmem>>, vector<1x8x128xf32>,
    %281 = arith.addf %211, %265 : vector<8x128xf32>
    %c3_49 = arith.constant 3 : index
    %282 = arith.index_cast %1 : i32 to index
    %c0_50 = arith.constant 0 : index
    %283 = vector.load %arg2[%c3_49, %282, %c0_50] : memref<4x8x128xf32, #tpu.memory_space<vmem>>, vector<1x8x128xf32>
    %284 = vector.shape_cast %283 : vector<1x8x128xf32> to vector<8x128xf32>
    %285 = vector.shape_cast %281 : vector<8x128xf32> to vector<1x8x128xf32>
    tpu.vector_store %arg2[%c3_49, %282, %c0_50], %285 {strides = array<i32>} : memref<4x8x128xf32, #tpu.memory_space<vmem>>, vector<1x8x128xf32>,
    %c1_i32 = arith.constant 1 : i32
    return
  }
  func.func @transform_0(%arg0: i32) -> (i32, i32, i32) {
    %c0_i32 = arith.constant 0 : i32
    %c0_i32_0 = arith.constant 0 : i32
    %c0_i32_1 = arith.constant 0 : i32
    return %c0_i32, %arg0, %c0_i32_0 : i32, i32, i32
  }
  func.func @transform_1(%arg0: i32) -> (i32, i32, i32) {
    %c0_i32 = arith.constant 0 : i32
    %c0_i32_0 = arith.constant 0 : i32
    %c0_i32_1 = arith.constant 0 : i32
    return %c0_i32, %arg0, %c0_i32_0 : i32, i32, i32
  }
}

</mosaic_0001>

<bundles_post_ra>
// kernel: tpu_custom_call.1
= control target key start
LH: loop header
LB: loop body
LE: loop exit
PB: predicated region body
PF: predicated region fallthrough
CT: control target
= control target key end

     0   :  { %6 = vsyncpa [#allocation3], 0  ;;  %s453_s0 = inlined_call_operand.hbm [shape: f32[27,8,128], index: 0, kind: input, shape index: {}]   ;;  %s454_s1 = inlined_call_operand.hbm [shape: f32[4,8,128], index: 1, kind: output, shape index: {}]  }
   0x1   :  { %7 = vsyncpa [#allocation4], 0  ;;  %s400_s6 = smov [#allocation2]  }
   0x2   :  { %s13_s7 = sshll.u32 %s400_s6, 4  ;;  %s14_s7 = int_to_ptr.vmem [resolvable:$true] %s13_s7 }
   0x3   :  { %s364_s8 = scalar_lea.vmem %s14_s7, 3456  ;;  %p369_p1 = scmp.lt.s32.totalorder %s14_s7, %s14_s7 }
   0x4   :  { %p365_p0 = scmp.ne.s32.totalorder %s14_s7, %s364_s8  ;;  %p370_p2 = scmp.lt.s32.totalorder %s364_s8, %s364_s8 }
   0x6   :  { %p371_p3 = por %p370_p2, %p369_p1 }
   0x8   :  { %p372_p4 = pnand %p371_p3, %p365_p0 }
   0xa   :  { %375 = shalt.err (!%p372_p4)
}
   0xb   :  { %s401_s9 = smov 128   ;;  %s402_s10 = smov 8  }
   0xc   :  { %19 = dma.hbm_to_vmem [thread:$0]  %s453_s0, 3456, %s14_s7, [#allocation3], %s401_s9, %s401_s9, %s402_s10  }
   0xd   :  { %396 = dma.done.wait [#allocation3], 3456  }
   0xe   :  { %397 = vsyncadd [#allocation3], 4294963840  ;;  %v68_v0 = vld [vmem:[#allocation2 + $0x78] sm:$0xff]  ;;  %v71_v1 = vld [vmem:[#allocation2 + $0x80] sm:$0xff]  ;;  %s403_s0 = smov [#allocation5]  }
   0xf   :  { %v23_v2 = vld [vmem:[#allocation2] sm:$0xff]  ;;  %v26_v3 = vld [vmem:[#allocation2 + $0x8] sm:$0xff]  ;;  %v29_v4 = vld [vmem:[#allocation2 + $0x10] sm:$0xff]  ;;  %s301_s13 = sshll.u32 %s403_s0, 4  ;;  %s302_s13 = int_to_ptr.vmem [resolvable:$true] %s301_s13 }
  0x10   :  { %v32_v5 = vld [vmem:[#allocation2 + $0x18] sm:$0xff]  ;;  %v35_v6 = vld [vmem:[#allocation2 + $0x20] sm:$0xff]  ;;  %v41_v7 = vld [vmem:[#allocation2 + $0x30] sm:$0xff]  ;;  %v420_v25 = vmul.f32 %v23_v2, %v23_v2  ;;  %v422_v26 = vmul.f32 %v26_v3, %v26_v3  ;;  %v424_v27 = vmul.f32 %v29_v4, %v29_v4  ;;  %s376_s14 = scalar_lea.vmem %s302_s13, 512  ;;  %p381_p6 = scmp.lt.s32.totalorder %s302_s13, %s302_s13 }
  0x11   :  { %v38_v8 = vld [vmem:[#allocation2 + $0x28] sm:$0xff]  ;;  %v44_v9 = vld [vmem:[#allocation2 + $0x38] sm:$0xff]  ;;  %v47_v10 = vld [vmem:[#allocation2 + $0x40] sm:$0xff]  ;;  %v105_v11 = vmul.f32 %v68_v0, %v32_v5  ;;  %v106_v12 = vmul.f32 %v71_v1, %v41_v7  ;;  %v110_v15 = vmul.f32 %v68_v0, %v35_v6  ;;  %p377_p5 = scmp.ne.s32.totalorder %s302_s13, %s376_s14  ;;  %p382_p7 = scmp.lt.s32.totalorder %s376_s14, %s376_s14 }
  0x12   :  { %v50_v13 = vld [vmem:[#allocation2 + $0x48] sm:$0xff]  ;;  %v111_v16 = vmul.f32 %v71_v1, %v44_v9  ;;  %v115_v17 = vmul.f32 %v68_v0, %v38_v8  ;;  %v116_v18 = vmul.f32 %v71_v1, %v47_v10  ;;  %v53_v19 = vld [vmem:[#allocation2 + $0x50] sm:$0xff]  ;;  %v56_v20 = vld [vmem:[#allocation2 + $0x58] sm:$0xff] }
  0x13   :  { %v74_v14 = vld [vmem:[#allocation2 + $0x88] sm:$0xff]  ;;  %v59_v21 = vld [vmem:[#allocation2 + $0x60] sm:$0xff]  ;;  %v80_v22 = vld [vmem:[#allocation2 + $0x98] sm:$0xff]  ;;  %v107_v31 = vadd.f32 %v106_v12, %v105_v11  ;;  %p383_p8 = por %p382_p7, %p381_p6 }
  0x14   :  { %v92_v23 = vld [vmem:[#allocation2 + $0xb8] sm:$0xff]  ;;  %v95_v24 = vld [vmem:[#allocation2 + $0xc0] sm:$0xff]  ;;  %v62_v28 = vld [vmem:[#allocation2 + $0x68] sm:$0xff]  ;;  %v108_v32 = vmul.f32 %v74_v14, %v50_v13  ;;  %v113_v33 = vmul.f32 %v74_v14, %v53_v19  ;;  %v118_v34 = vmul.f32 %v74_v14, %v56_v20  ;;  %v112_v36 = vadd.f32 %v111_v16, %v110_v15 }
  0x15   :  { %v83_v29 = vld [vmem:[#allocation2 + $0xa0] sm:$0xff]  ;;  %v98_v30 = vld [vmem:[#allocation2 + $0xc8] sm:$0xff]  ;;  %v65_v35 = vld [vmem:[#allocation2 + $0x70] sm:$0xff]  ;;  %v117_v37 = vadd.f32 %v116_v18, %v115_v17  ;;  %v120_v38 = vmul.f32 %v68_v0, %v59_v21  ;;  %v121_v39 = vmul.f32 %v71_v1, %v62_v28  ;;  %v126_v41 = vmul.f32 %v80_v22, %v32_v5  ;;  %p384_p9 = pnand %p383_p8, %p377_p5 }
  0x16   :  { %v123_v40 = vmul.f32 %v74_v14, %v65_v35  ;;  %v147_v42 = vmul.f32 %v92_v23, %v32_v5  ;;  %v148_v43 = vmul.f32 %v95_v24, %v41_v7  ;;  %v127_v44 = vmul.f32 %v83_v29, %v41_v7  ;;  %v86_v52 = vld [vmem:[#allocation2 + $0xa8] sm:$0xff]  ;;  %v101_v5 = vld [vmem:[#allocation2 + $0xd0] sm:$0xff] }
  0x17   :  { %v150_v45 = vmul.f32 %v98_v30, %v50_v13  ;;  %v152_v46 = vmul.f32 %v92_v23, %v35_v6  ;;  %v153_v47 = vmul.f32 %v95_v24, %v44_v9  ;;  %v131_v48 = vmul.f32 %v80_v22, %v35_v6 }
  0x18   :  { %v149_v49 = vadd.f32 %v148_v43, %v147_v42  ;;  %v155_v50 = vmul.f32 %v98_v30, %v53_v19  ;;  %v157_v51 = vmul.f32 %v92_v23, %v38_v8  ;;  %v132_v53 = vmul.f32 %v83_v29, %v44_v9 }
  0x19   :  { %v154_v54 = vadd.f32 %v153_v47, %v152_v46  ;;  %v158_v55 = vmul.f32 %v95_v24, %v47_v10  ;;  %v160_v56 = vmul.f32 %v98_v30, %v56_v20  ;;  %v162_v58 = vmul.f32 %v92_v23, %v59_v21 }
  0x1a   :  { %v151_v57 = vadd.f32 %v150_v45, %v149_v49  ;;  %v163_v59 = vmul.f32 %v95_v24, %v62_v28  ;;  %v165_v60 = vmul.f32 %v98_v30, %v65_v35  ;;  %v136_v61 = vmul.f32 %v80_v22, %v38_v8  ;;  %v89_v49 = vld [vmem:[#allocation2 + $0xb0] sm:$0xff] }
  0x1b   :  { %v137_v62 = vmul.f32 %v83_v29, %v47_v10  ;;  %v156_v63 = vadd.f32 %v155_v50, %v154_v54  ;;  %v159_v0 = vadd.f32 %v158_v55, %v157_v51  ;;  %v109_v1 = vadd.f32 %v108_v32, %v107_v31 }
  0x1c   :  { %v128_v2 = vadd.f32 %v127_v44, %v126_v41  ;;  %v129_v3 = vmul.f32 %v86_v52, %v50_v13  ;;  %v164_v4 = vadd.f32 %v163_v59, %v162_v58  ;;  %v133_v6 = vadd.f32 %v132_v53, %v131_v48  ;;  %v77_v48 = vld [vmem:[#allocation2 + $0x90] sm:$0xff] }
  0x1d   :  { %v134_v7 = vmul.f32 %v86_v52, %v53_v19  ;;  %v161_v11 = vadd.f32 %v160_v56, %v159_v0  ;;  %v174_v9 = vmul.f32 %v151_v57, %v420_v25  ;;  %v141_v12 = vmul.f32 %v80_v22, %v59_v21 }
  0x1e   :  { %v142_v14 = vmul.f32 %v83_v29, %v62_v28  ;;  %v166_v15 = vadd.f32 %v165_v60, %v164_v4  ;;  %v175_v16 = vmul.f32 %v156_v63, %v422_v26  ;;  %v138_v17 = vadd.f32 %v137_v62, %v136_v61 }
  0x1f   :  { %v139_v8 = vmul.f32 %v86_v52, %v56_v20  ;;  %v176_v10 = vmul.f32 %v161_v11, %v424_v27  ;;  %v177_v18 = vmul.f32 %v174_v9, %v151_v57  ;;  %v114_v23 = vadd.f32 %v113_v33, %v112_v36 }
  0x20   :  { %v122_v24 = vadd.f32 %v121_v39, %v120_v38  ;;  %v167_v13 = vadd.f32 %v166_v15, %v101_v5  ;;  %v178_v30 = vmul.f32 %v175_v16, %v156_v63  ;;  %v119_v31 = vadd.f32 %v118_v34, %v117_v37 }
  0x21   :  { %v130_v32 = vadd.f32 %v129_v3, %v128_v2  ;;  %v135_v19 = vadd.f32 %v134_v7, %v133_v6  ;;  %v180_v41 = vmul.f32 %v176_v10, %v161_v11  ;;  %v143_v42 = vadd.f32 %v142_v14, %v141_v12 }
  0x22   :  { %v144_v43 = vmul.f32 %v86_v52, %v65_v35  ;;  %v179_v21 = vadd.f32 %v178_v30, %v177_v18  ;;  %v182_v22 = vmul.f32 %v167_v13, %v167_v13  ;;  %v140_v28 = vadd.f32 %v139_v8, %v138_v17 }
  0x23   :  { %v168_v29 = vmul.f32 %v109_v1, %v420_v25  ;;  %v169_v20 = vmul.f32 %v114_v23, %v422_v26  ;;  %v171_v45 = vmul.f32 %v130_v32, %v420_v25  ;;  %v172_v33 = vmul.f32 %v135_v19, %v422_v26 }
  0x24   :  { %v181_v44 = vadd.f32 %v180_v41, %v179_v21  ;;  %v124_v36 = vadd.f32 %v123_v40, %v122_v24  ;;  %v145_v38 = vadd.f32 %v144_v43, %v143_v42  ;;  %v170_v34 = vmul.f32 %v119_v31, %v424_v27 }
  0x25   :  { %v173_v39 = vmul.f32 %v140_v28, %v424_v27  ;;  %v186_v35 = vmul.f32 %v168_v29, %v109_v1  ;;  %v187_v46 = vmul.f32 %v169_v20, %v114_v23  ;;  %v194_v47 = vmul.f32 %v168_v29, %v130_v32 }
  0x26   :  { %v183_v37 = vsub.f32 %v181_v44, %v182_v22  ;;  %v195_v51 = vmul.f32 %v169_v20, %v135_v19  ;;  %v210_v52 = vmul.f32 %v168_v29, %v151_v57  ;;  %v211_v53 = vmul.f32 %v169_v20, %v156_v63 }
  0x27   :  { %v202_v54 = vmul.f32 %v171_v45, %v130_v32  ;;  %v203_v25 = vmul.f32 %v172_v33, %v135_v19  ;;  %v218_v55 = vmul.f32 %v171_v45, %v151_v57  ;;  %v219_v26 = vmul.f32 %v172_v33, %v156_v63 }
  0x28   :  { %v184_v50 = vsub.f32 0.0, %v183_v37  ;;  %v125_v40 = vadd.f32 %v124_v36, %v77_v48  ;;  %v146_v56 = vadd.f32 %v145_v38, %v89_v49  ;;  %v188_v58 = vadd.f32 %v187_v46, %v186_v35 }
  0x29   :  { %v189_v59 = vmul.f32 %v170_v34, %v119_v31  ;;  %v196_v60 = vadd.f32 %v195_v51, %v194_v47  ;;  %v197_v27 = vmul.f32 %v170_v34, %v140_v28  ;;  %v212_v61 = vadd.f32 %v211_v53, %v210_v52 }
  0x2a   :  { %346 = vrcp.f32 %v184_v50  ;;  %v213_v62 = vmul.f32 %v170_v34, %v161_v11  ;;  %v204_v0 = vadd.f32 %v203_v25, %v202_v54  ;;  %v205_v1 = vmul.f32 %v173_v39, %v140_v28 }
  0x2b   :  { %v220_v2 = vadd.f32 %v219_v26, %v218_v55  ;;  %v221_v3 = vmul.f32 %v173_v39, %v161_v11  ;;  %v191_v4 = vmul.f32 %v125_v40, %v125_v40  ;;  %v199_v5 = vmul.f32 %v146_v56, %v125_v40 }
  0x2c   :  { %v190_v6 = vadd.f32 %v189_v59, %v188_v58  ;;  %v207_v7 = vmul.f32 %v146_v56, %v146_v56  ;;  %v214_v9 = vadd.f32 %v213_v62, %v212_v61  ;;  %v215_v57 = vmul.f32 %v167_v13, %v125_v40 }
  0x2d   :  { %v198_v63 = vadd.f32 %v197_v27, %v196_v60  ;;  %v206_v12 = vadd.f32 %v205_v1, %v204_v0  ;;  %v222_v14 = vadd.f32 %v221_v3, %v220_v2  ;;  %v223_v15 = vmul.f32 %v167_v13, %v146_v56 }
  0x2e   :  { %v192_v16 = vsub.f32 %v190_v6, %v191_v4  ;;  %v216_v17 = vsub.f32 %v214_v9, %v215_v57 }
  0x2f   :  { %v200_v8 = vsub.f32 %v198_v63, %v199_v5  ;;  %v208_v10 = vsub.f32 %v206_v12, %v207_v7  ;;  %v224_v18 = vsub.f32 %v222_v14, %v223_v15 }
  0x37   :  { %v347_v23 = vpop.eup %346 }
  0x38   :  { %v193_v24 = vmul.f32 %v347_v23, %v192_v16  ;;  %v435_v30 = vmul.f32 %v347_v23, %v216_v17  ;;  %v201_v11 = vmul.f32 %v347_v23, %v200_v8  ;;  %v209_v31 = vmul.f32 %v347_v23, %v208_v10 }
  0x39   :  { %v437_v32 = vmul.f32 %v347_v23, %v224_v18 }
  0x3a   :  { %v228_v19 = vmul.f32 %v435_v30, %v435_v30  ;;  %v226_v2 = vsub.f32 0.0, %v435_v30 }
  0x3b   :  { %v230_v41 = vmul.f32 %v437_v32, %v435_v30  ;;  %v232_v13 = vmul.f32 %v437_v32, %v437_v32  ;;  %v227_v7 = vsub.f32 0.0, %v437_v32 }
  0x3c   :  { %v229_v42 = vadd.f32 %v228_v19, %v193_v24 }
  0x3d   :  { %v231_v43 = vadd.f32 %v230_v41, %v201_v11  ;;  %v233_v21 = vadd.f32 %v232_v13, %v209_v31 }
  0x3f   :  { %v236_v22 = vsub.f32 %v229_v42, %v233_v21  ;;  %v238_v28 = vmul.f32 4.0, %v231_v43  ;;  %v234_v39 = vadd.f32 %v233_v21, %v229_v42 }
  0x41   :  { %v237_v29 = vmul.f32 %v236_v22, %v236_v22  ;;  %v239_v20 = vmul.f32 %v238_v28, %v231_v43  ;;  %v235_v46 = vmul.f32 0.5, %v234_v39 }
  0x43   :  { %v240_v44 = vadd.f32 %v239_v20, %v237_v29 }
  0x45   :  { %348 = vrsqrt.f32 %v240_v44  ;;  %vm243_vm0 = vcmp.eq.f32.partialorder %v240_v44, inf  ;;  %v246_v33 = vand.u32 2147483648, %v240_v44  ;;  %vm245_vm1 = vcmp.eq.f32.partialorder %v240_v44, 0.0 }
  0x52   :  { %v349_v45 = vpop.eup %348 }
  0x53   :  { %v242_v36 = vmul.f32 %v349_v45, %v240_v44 }
  0x55   :  { %v244_v38 = vsel %vm243_vm0, %v240_v44, %v242_v36 }
  0x56   :  { %v247_v34 = vsel %vm245_vm1, %v246_v33, %v244_v38 }
  0x57   :  { %vm253_vm2 = vcmp.gt.f32.partialorder %v247_v34, 0.0  ;;  %v248_v47 = vmul.f32 0.5, %v247_v34 }
  0x58   :  { %v254_v37 = vsel %vm253_vm2, %v247_v34, 1.0 }
  0x59   :  { %350 = vrcp.f32 %v254_v37  ;;  %v249_v50 = vadd.f32 %v248_v47, %v235_v46  ;;  %v251_v51 = vsub.f32 %v235_v46, %v248_v47 }
  0x5b   :  { %v250_v54 = vand.u32 2147483647, %v249_v50  ;;  %v252_v25 = vand.u32 2147483647, %v251_v51 }
  0x66   :  { %v351_v35 = vpop.eup %350 }
  0x67   :  { %v256_v48 = vmul.f32 %v351_v35, %v236_v22 }
  0x69   :  { %v257_v49 = vsel %vm253_vm2, %v256_v48, 1.0 }
  0x6a   :  { %v258_v52 = vadd.f32 1.0, %v257_v49 }
  0x6c   :  { %v259_v53 = vmul.f32 0.5, %v258_v52 }
  0x6e   :  { %v260_v55 = vmax.f32 %v259_v53, 0.0 }
  0x70   :  { %v261_v26 = vmin.f32 %v260_v55, 1.0 }
  0x72   :  { %v262_v40 = vsub.f32 1.0, %v261_v26  ;;  %v263_v56 = vmul.f32 %v261_v26, %v250_v54  ;;  %v275_v58 = vmul.f32 %v261_v26, %v252_v25 }
  0x74   :  { %v264_v59 = vmul.f32 %v262_v40, %v252_v25  ;;  %v274_v60 = vmul.f32 %v262_v40, %v250_v54 }
  0x76   :  { %v265_v27 = vadd.f32 %v264_v59, %v263_v56  ;;  %v276_v61 = vadd.f32 %v275_v58, %v274_v60 }
  0x78   :  { %v266_v62 = vmax.f32 %v265_v27, 0.0  ;;  %v277_v0 = vmax.f32 %v276_v61, 0.0 }
  0x7a   :  { %352 = vrsqrt.f32 %v266_v62  ;;  %vm269_vm3 = vcmp.eq.f32.partialorder %v266_v62, inf  ;;  %v272_v3 = vand.u32 2147483648, %v266_v62  ;;  %vm271_vm4 = vcmp.eq.f32.partialorder %v266_v62, 0.0 }
  0x7b   :  { %354 = vrsqrt.f32 %v277_v0  ;;  %vm280_vm5 = vcmp.eq.f32.partialorder %v277_v0, inf  ;;  %v283_v6 = vand.u32 2147483648, %v277_v0  ;;  %vm282_vm6 = vcmp.eq.f32.partialorder %v277_v0, 0.0 }
  0x87   :  { %v353_v1 = vpop.eup %352 }
  0x88   :  { %v355_v4 = vpop.eup %354  ;;  %v268_v5 = vmul.f32 %v353_v1, %v266_v62 }
  0x89   :  { %v279_v9 = vmul.f32 %v355_v4, %v277_v0 }
  0x8a   :  { %v270_v57 = vsel %vm269_vm3, %v266_v62, %v268_v5 }
  0x8b   :  { %v273_v63 = vsel %vm271_vm4, %v272_v3, %v270_v57  ;;  %v281_v12 = vsel %vm280_vm5, %v277_v0, %v279_v9 }
  0x8c   :  { %v285_v14 = vsub.f32 %v226_v2, %v273_v63  ;;  %v284_v15 = vsel %vm282_vm6, %v283_v6, %v281_v12  ;;  %v290_v16 = vadd.f32 %v273_v63, %v226_v2 }
  0x8d   :  { %v287_v17 = vsub.f32 %v227_v7, %v284_v15  ;;  %v293_v8 = vadd.f32 %v284_v15, %v227_v7 }
  0x8e   :  { %286 = vst [vmem:[#allocation5] sm:$0xff] %v285_v14  ;;  %292 = vst [vmem:[#allocation5 + $0x10] sm:$0xff] %v290_v16 }
  0x8f   :  { %289 = vst [vmem:[#allocation5 + $0x8] sm:$0xff] %v287_v17  ;;  %295 = vst [vmem:[#allocation5 + $0x18] sm:$0xff] %v293_v8 }
  0x90   :  { %387 = shalt.err (!%p384_p9)
}
  0x91   :  { %307 = dma.vmem_to_hbm [thread:$0]  %s302_s13, 512, %s454_s1, [#allocation4], %s401_s9, %s401_s9, %s402_s10  }
  0x92   :  { %398 = dma.done.wait [#allocation4], 512  }
  0x93   :  { %399 = vsyncadd [#allocation4], 4294966784 }
  0x94   :  { %311 = vsyncpa [#allocation3], 1 }
  0x95   :  { %312 = vsyncpa [#allocation4], 1 }

</bundles_post_ra>
